<compile_context>
chip_gen: v7x
topology: tpu7x:2x2x1
jax: 0.10.0
libtpu: 0.0.40
codegen_flags: <defaults>
</compile_context>

<pallas_src>
import functools

import jax
import jax.numpy as jnp
from jax.experimental import pallas as pl
from jax.experimental.pallas import tpu as pltpu


LANE = 128      # TPU lane width: last-dim tiling unit
SUBLANE = 8     # TPU sublane width: second-to-last-dim tiling unit


def _round_up(x, m):
    return ((x + m - 1) // m) * m


def _affine_kernel(x_ref, w_ref, b_ref, o_ref):
    # Single fused affine: y = x @ W + b, all operands already in VMEM.
    # x feeds the MXU in its native dtype; accumulation is f32.
    acc = jnp.dot(x_ref[...], w_ref[...], preferred_element_type=jnp.float32)
    o_ref[...] = (acc + b_ref[...]).astype(o_ref.dtype)


@functools.partial(jax.jit, static_argnames=("tile_n",))
def blob_model_forward(x, params, tile_n=256):
    """x: [N, input_features]. params: per-layer (w, b) with w as [in, out]
    and b as [1, out] (i.e. already transposed relative to PyTorch)."""
    w1, b1 = params["w1"], params["b1"]
    w2, b2 = params["w2"], params["b2"]
    w3, b3 = params["w3"], params["b3"]

    # ---- Fold the activation-free stack into one affine map (tiny, O(h^2),
    #      done once under jit -- never per grid step).
    w = w1 @ w2 @ w3                      # [in_features, out_features]
    b = (b1 @ w2 + b2) @ w3 + b3          # [1, out_features]

    n, in_f = x.shape
    out_f = w.shape[1]

    # ---- Lane-dense output: pad out_features up to a multiple of 128 so the
    #      store path and the output DMA move full lane rows.
    out_pad = _round_up(max(out_f, LANE), LANE)
    w_p = jnp.zeros((in_f, out_pad), w.dtype).at[:, :out_f].set(w)
    b_p = jnp.zeros((1, out_pad), b.dtype).at[:, :out_f].set(b)

    # ---- Batch tiling: tile_n rows per grid step (sublane-aligned); pad the
    #      batch only if needed so the grid covers it exactly.
    eff_tile = min(_round_up(tile_n, SUBLANE), _round_up(n, SUBLANE))
    n_pad = _round_up(n, eff_tile)
    x_p = x if n_pad == n else jnp.zeros((n_pad, in_f), x.dtype).at[:n, :].set(x)
    grid = (n_pad // eff_tile,)

    cost = pl.CostEstimate(
        flops=2 * n_pad * in_f * out_pad,
        transcendentals=0,
        bytes_accessed=4 * (n_pad * in_f + in_f * out_pad + out_pad + n_pad * out_pad),
    )

    out_padded = pl.pallas_call(
        _affine_kernel,
        out_shape=jax.ShapeDtypeStruct((n_pad, out_pad), x.dtype),
        grid_spec=pltpu.PrefetchScalarGridSpec(
            num_scalar_prefetch=0,
            grid=grid,
            in_specs=[
                # x: one batch tile per grid step (double-buffered by Pallas).
                pl.BlockSpec((eff_tile, in_f), lambda i: (i, 0)),
                # Fused weight / bias: same block every step -> VMEM-resident.
                pl.BlockSpec((in_f, out_pad), lambda i: (0, 0)),
                pl.BlockSpec((1, out_pad), lambda i: (0, 0)),
            ],
            out_specs=pl.BlockSpec((eff_tile, out_pad), lambda i: (i, 0)),
        ),
        compiler_params=pltpu.CompilerParams(
            dimension_semantics=("parallel",),
        ),
        cost_estimate=cost,
    )(x_p, w_p, b_p)

    # Strip batch + lane padding outside the kernel.
    return out_padded[:n, :out_f]


def init_blob_params(key, input_features, output_features, hidden_units=8):
    """Deterministic init mimicking nn.Linear's U(-1/sqrt(fan_in), 1/sqrt(fan_in))."""
    def linear(key, fan_in, fan_out):
        kw, kb = jax.random.split(key)
        bound = 1.0 / jnp.sqrt(float(fan_in))
        # Stored as [in, out] (transposed relative to PyTorch's [out, in]).
        w = jax.random.uniform(kw, (fan_in, fan_out), jnp.float32, -bound, bound)
        b = jax.random.uniform(kb, (1, fan_out), jnp.float32, -bound, bound)
        return w, b

    k1, k2, k3 = jax.random.split(key, 3)
    w1, b1 = linear(k1, input_features, hidden_units)
    w2, b2 = linear(k2, hidden_units, hidden_units)
    w3, b3 = linear(k3, hidden_units, output_features)
    return {"w1": w1, "b1": b1, "w2": w2, "b2": b2, "w3": w3, "b3": b3}


def _reference_forward(x, params):
    # Layer-by-layer reference: matches the original 3-Linear PyTorch stack.
    h1 = x @ params["w1"] + params["b1"]
    h2 = h1 @ params["w2"] + params["b2"]
    return h2 @ params["w3"] + params["b3"]


if __name__ == "__main__":
    key = jax.random.PRNGKey(0)
    k_params, k_x = jax.random.split(key)

    input_features = 2      # typical "blobs" classification: 2-D points
    output_features = 4     # 4 classes
    hidden_units = 8
    batch = 128             # >1 grid step with tile_n=64 to exercise pipelining

    params = init_blob_params(k_params, input_features, output_features, hidden_units)
    x = jax.random.normal(k_x, (batch, input_features), dtype=jnp.float32)

    out = blob_model_forward(x, params, tile_n=64)
    out = jax.block_until_ready(out)

    ref = _reference_forward(x, params)
    assert out.shape == (batch, output_features), out.shape
    assert jnp.allclose(out, ref, atol=1e-4, rtol=1e-4), "mismatch vs reference"

    print("KERNEL_OK")
</pallas_src>

<mosaic_0001>
module attributes {stable_mosaic.version = 11 : i64} {
  func.func @_affine_kernel(%arg0: i32, %arg1: memref<64x2xf32, #tpu.memory_space<vmem>>, %arg2: memref<2x128xf32, #tpu.memory_space<vmem>>, %arg3: memref<1x128xf32, #tpu.memory_space<vmem>>, %arg4: memref<64x128xf32, #tpu.memory_space<vmem>>) attributes {dimension_semantics = [#tpu.dimension_semantics<parallel>], iteration_bounds = array<i64: 2>, scalar_prefetch = 0 : i64, scratch_operands = 0 : i64, tpu.core_type = #tpu.core_type<tc>, window_params = [{transform_indices = @transform_0, window_bounds = array<i64: 64, 2>}, {pipeline_mode = #tpu.pipeline_mode<synchronous>, transform_indices = @transform_1, window_bounds = array<i64: 2, 128>}, {pipeline_mode = #tpu.pipeline_mode<synchronous>, transform_indices = @transform_2, window_bounds = array<i64: 1, 128>}, {transform_indices = @transform_3, window_bounds = array<i64: 64, 128>}]} {
    %c0 = arith.constant 0 : index
    %c0_0 = arith.constant 0 : index
    %0 = vector.load %arg1[%c0, %c0_0] : memref<64x2xf32, #tpu.memory_space<vmem>>, vector<64x2xf32>
    %c0_1 = arith.constant 0 : index
    %c0_2 = arith.constant 0 : index
    %1 = vector.load %arg2[%c0_1, %c0_2] : memref<2x128xf32, #tpu.memory_space<vmem>>, vector<2x128xf32>
    %cst = arith.constant dense<0.000000e+00> : vector<64x128xf32>
    %2 = tpu.matmul %0, %1, %cst {dimension_numbers = #tpu.dot_dimension_numbers<[1], [0], [0], [1], [0, 0, 1, 1], [], []>} : vector<64x2xf32>, vector<2x128xf32>, vector<64x128xf32> -> vector<64x128xf32>
    %c0_3 = arith.constant 0 : index
    %c0_4 = arith.constant 0 : index
    %3 = vector.load %arg3[%c0_3, %c0_4] : memref<1x128xf32, #tpu.memory_space<vmem>>, vector<1x128xf32>
    %4 = vector.broadcast %3 : vector<1x128xf32> to vector<64x128xf32>
    %5 = arith.addf %2, %4 : vector<64x128xf32>
    %c0_5 = arith.constant 0 : index
    %c0_6 = arith.constant 0 : index
    %6 = vector.load %arg4[%c0_5, %c0_6] : memref<64x128xf32, #tpu.memory_space<vmem>>, vector<64x128xf32>
    tpu.vector_store %arg4[%c0_5, %c0_6], %5 {strides = array<i32>} : memref<64x128xf32, #tpu.memory_space<vmem>>, vector<64x128xf32>,
    return
  }
  func.func @transform_0(%arg0: i32) -> (i32, i32) {
    %c0_i32 = arith.constant 0 : i32
    %c0_i32_0 = arith.constant 0 : i32
    return %arg0, %c0_i32 : i32, i32
  }
  func.func @transform_1(%arg0: i32) -> (i32, i32) {
    %c0_i32 = arith.constant 0 : i32
    %c0_i32_0 = arith.constant 0 : i32
    %c0_i32_1 = arith.constant 0 : i32
    return %c0_i32, %c0_i32_0 : i32, i32
  }
  func.func @transform_2(%arg0: i32) -> (i32, i32) {
    %c0_i32 = arith.constant 0 : i32
    %c0_i32_0 = arith.constant 0 : i32
    %c0_i32_1 = arith.constant 0 : i32
    return %c0_i32, %c0_i32_0 : i32, i32
  }
  func.func @transform_3(%arg0: i32) -> (i32, i32) {
    %c0_i32 = arith.constant 0 : i32
    %c0_i32_0 = arith.constant 0 : i32
    return %arg0, %c0_i32 : i32, i32
  }
}

</mosaic_0001>

<bundles_post_ra>
// kernel: blob_model_forward.1
= control target key start
LH: loop header
LB: loop body
LE: loop exit
PB: predicated region body
PF: predicated region fallthrough
CT: control target
= control target key end

     0   :  { %s470_s12 = smov 0   ;;  %s501_s0 = inlined_call_operand.vmem [shape: f32[128,2], index: 0, kind: input, shape index: {}]   ;;  %s502_s1 = inlined_call_operand.vmem [shape: f32[2,128], index: 1, kind: input, shape index: {}]   ;;  %s503_s2 = inlined_call_operand.vmem [shape: f32[1,128], index: 2, kind: input, shape index: {}]   ;;  %s504_s3 = inlined_call_operand.vmem [shape: f32[128,128], index: 3, kind: output, shape index: {}]  }
   0x1 LB: > { %s388_s13 = sadd.s32 4294967295, %s448_s12   ;;  %p392_p0 = scmp.ge.s32.totalorder %s448_s12, 1  ;;  %s448_s12 = sphi %s470_s12, %s13_s12  }
   0x2   : > { %p138_p1 = scmp.lt.s32.totalorder %s448_s12, 3 }
   0x4   : > { %p139_p2 = pnand %p392_p0, %p138_p1 }
   0x5   : > { %v182_v0 = vld [vmem:[%s502_s1] sm:$0x3] (!%p139_p2)  ;;  %vm215_vm0 = vcmask (!%p139_p2), 1041408   ;;  %s393_s16 = sshll.u32 (!%p139_p2), %s388_s13, 3  ;;  %vm190_vm1 = vcmask (!%p139_p2), 15360  }
   0x6   : > { %142 = sbr.rel (%p139_p2) target bundleno = 239 (0xef), region = 32  ;;  %418 = vmatprep.subr.msk.mxu0 (!%p139_p2), %vm215_vm0, %v182_v0  ;;  %432 = vmatprep.subr.msk.mxu1 (!%p139_p2), %vm215_vm0, %v182_v0  ;;  %p163_p3 = scmp.lt.s32.totalorder (!%p139_p2), %s393_s16, 15  ;;  %v397_v9 = vld [vmem:[%s503_s2] ss:$0 sm:$0xff] (!%p139_p2) }
   0x7   : > { %419 = vmatpush3.msk.msra.mxu0 (!%p139_p2), %vm215_vm0, %v182_v0  ;;  %433 = vmatpush3.msk.msra.mxu1 (!%p139_p2), %vm215_vm0, %v182_v0 }
   0xd   : > { %s506_s16 = smov (!%p163_p3, %s393_s16), 15 }
   0xe   : > { %s394_s17 = sshll.u32 %s506_s16, 3 }
   0xf   : > { %s166_s20 = scalar_lea.vmem %s501_s0, %s394_s17  ;;  %s172_s25 = scalar_lea.vmem %s504_s3, %s394_s17 }
  0x10   : > { %v174_v1 = vld [vmem:[%s166_s20] sm:$0xff]  ;;  %v175_v3 = vld [vmem:[%s166_s20 + $0x8] sm:$0xff]  ;;  %v176_v5 = vld [vmem:[%s166_s20 + $0x10] sm:$0xff] }
  0x11   : > { %v178_v2 = vld [vmem:[%s166_s20 + $0x20] sm:$0xff]  ;;  %420 = vmatprep.mubr.msk.f32.mxu0 %vm190_vm1, %v174_v1  ;;  %v179_v4 = vld [vmem:[%s166_s20 + $0x28] sm:$0xff]  ;;  %v180_v6 = vld [vmem:[%s166_s20 + $0x30] sm:$0xff] }
  0x12   : > { %426 = vmatprep.mubr.msk.f32.mxu1 %vm190_vm1, %v178_v2  ;;  %421 = vmatmul.mubr.msk.f32.vlgmr.msra.gmra.mrb[0].mxu0 %vm190_vm1, %v175_v3  ;;  %v177_v7 = vld [vmem:[%s166_s20 + $0x18] sm:$0xff] }
  0x13   : > { %427 = vmatmul.mubr.msk.f32.vlgmr.msra.gmra.mrb[0].mxu1 %vm190_vm1, %v179_v4  ;;  %423 = vmatprep.mubr.msk.f32.mxu0 %vm190_vm1, %v176_v5  ;;  %v181_v8 = vld [vmem:[%s166_s20 + $0x38] sm:$0xff] }
  0x14   : > { %429 = vmatprep.mubr.msk.f32.mxu1 %vm190_vm1, %v180_v6 }
  0x16   : > { %424 = vmatmul.mubr.msk.f32.gmra.mrb[2].mxu0 %vm190_vm1, %v177_v7 }
  0x17   : > { %430 = vmatmul.mubr.msk.f32.gmra.mrb[2].mxu1 %vm190_vm1, %v181_v8 }
  0xe5   : > { %v422_v10 = vpop.f32.mrb[0].mxu0 }
  0xe6   : > { %v428_v11 = vpop.f32.mrb[0].mxu1  ;;  %v291_v12 = vadd.f32 %v422_v10, %v397_v9  ;;  %v285_v14 = vpop.f32.mrb[1].mxu0 }
  0xe7   : > { %v311_v13 = vadd.f32 %v428_v11, %v397_v9  ;;  %v305_v15 = vpop.f32.mrb[1].mxu1  ;;  %v286_v16 = vadd.f32 %v397_v9, %v285_v14 }
  0xe8   : > { %v306_v17 = vadd.f32 %v397_v9, %v305_v15  ;;  %325 = vst [vmem:[%s172_s25 + $0x8] sm:$0xff] %v291_v12 }
  0xe9   : > { %329 = vst [vmem:[%s172_s25 + $0x28] sm:$0xff] %v311_v13  ;;  %324 = vst [vmem:[%s172_s25] sm:$0xff] %v286_v16  ;;  %v425_v18 = vpop.f32.mrb[2].mxu0 }
  0xea   : > { %328 = vst [vmem:[%s172_s25 + $0x20] sm:$0xff] %v306_v17  ;;  %v431_v19 = vpop.f32.mrb[2].mxu1  ;;  %v301_v20 = vadd.f32 %v425_v18, %v397_v9  ;;  %v295_v22 = vpop.f32.mrb[3].mxu0 }
  0xeb   : > { %v321_v21 = vadd.f32 %v431_v19, %v397_v9  ;;  %v315_v23 = vpop.f32.mrb[3].mxu1  ;;  %v296_v24 = vadd.f32 %v397_v9, %v295_v22 }
  0xec   : > { %v316_v25 = vadd.f32 %v397_v9, %v315_v23  ;;  %327 = vst [vmem:[%s172_s25 + $0x18] sm:$0xff] %v301_v20 }
  0xed   : > { %331 = vst [vmem:[%s172_s25 + $0x38] sm:$0xff] %v321_v21  ;;  %326 = vst [vmem:[%s172_s25 + $0x10] sm:$0xff] %v296_v24 }
  0xee   : > { %330 = vst [vmem:[%s172_s25 + $0x30] sm:$0xff] %v316_v25 }
  0xef PF: > { %s13_s12 = sadd.s32 1, %s448_s12  }
  0xf0   : > { %p10_p4 = scmp.ge.s32.totalorder %s13_s12, 4  }
  0xf2   :  { %12 = sbr.rel (!%p10_p4) target bundleno = 1 (0x1), region = 62 }

</bundles_post_ra>
